<compile_context>
chip_gen: v7x
topology: tpu7x:2x2x1
jax: 0.10.0
libtpu: 0.0.40
codegen_flags: <defaults>
</compile_context>

<pallas_src>
import math

import jax
import jax.numpy as jnp
from jax import lax
from jax.experimental import pallas as pl
from jax.experimental.pallas import tpu as pltpu

# ---- small, module-consistent hyperparameters ----
EMBED_DIM = 32      # embed_dim
NUM_HEADS = 4       # num_heads (irrelevant after the seq_len==1 attention collapse)
FF_DIM = 64         # ff_dim
NUM_LAYERS = 2      # num_layers
VOCAB = 100         # stand-in vocab for the hash-based embedding table
BATCH = 8
NUM_TEXTS = 3       # texts per user
NUM_WORDS = 5       # words per text
LN_EPS = 1e-5       # nn.LayerNorm default eps

TW = NUM_TEXTS * NUM_WORDS                      # words per user
LAYER_W_COLS = EMBED_DIM + FF_DIM + EMBED_DIM   # wvo | w1 | w2 packed along lanes
W_ROWS = max(EMBED_DIM, FF_DIM)                 # 64
W_COLS = EMBED_DIM + NUM_LAYERS * LAYER_W_COLS  # proj | layer0 | layer1
LAYER_V_ROWS = 7                                # bvo, g1, be1, b1, b2, g2, be2
V_ROWS = 1 + NUM_LAYERS * LAYER_V_ROWS          # proj_b + per-layer vectors
V_COLS = FF_DIM                                 # 64 (32-wide vectors live in [:, :32])


def _layernorm(x, gamma, beta):
    mu = jnp.mean(x, axis=-1, keepdims=True)
    var = jnp.mean((x - mu) ** 2, axis=-1, keepdims=True)
    return (x - mu) * lax.rsqrt(var + LN_EPS) * gamma + beta


def _gelu_tanh(x):
    # tanh-approximate GELU: tanh goes to the EUP (its own VLIW slot) instead of a
    # VALU erf polynomial.  Max deviation from exact GELU ~1e-3.
    c = math.sqrt(2.0 / math.pi)
    return 0.5 * x * (1.0 + jnp.tanh(c * (x + 0.044715 * x * x * x)))


def bahe_kernel(ids_ref, emb_ref, w_ref, v_ref, out_ref):
    D, F = EMBED_DIM, FF_DIM
    ids = ids_ref[...]            # [B, TW] int32 word ids
    E = emb_ref[...]              # [VOCAB, D] embedding table
    W = w_ref[...]                # [W_ROWS, W_COLS] packed weight slab
    V = v_ref[...]                # [V_ROWS, V_COLS] packed bias / LayerNorm slab

    # --- fused SimpleTextEncoder: embedding gather + word mean + text mean ---
    # counts[b, v] = #occurrences of word v for user b; user_embed = (counts / TW) @ E.
    # Equal words-per-text and texts-per-user => mean-of-means == flat mean over TW words.
    vocab_iota = lax.broadcasted_iota(jnp.int32, (BATCH, VOCAB), 1)
    counts = jnp.zeros((BATCH, VOCAB), jnp.float32)
    for w in range(TW):           # unrolled: TW cheap [B, VOCAB] compare+adds on the VPU
        counts = counts + (ids[:, w:w + 1] == vocab_iota).astype(jnp.float32)
    x = jnp.dot(counts * (1.0 / TW), E, preferred_element_type=jnp.float32)   # [B, D]

    # --- projection: nn.Linear(embed_dim, embed_dim) ---
    h = jnp.dot(x, W[:D, 0:D], preferred_element_type=jnp.float32) + V[0:1, :D]

    # --- BehaviorInteractionModel: NUM_LAYERS TransformerBlocks (eval: dropout = identity) ---
    for l in range(NUM_LAYERS):
        woff = D + l * LAYER_W_COLS
        voff = 1 + l * LAYER_V_ROWS
        wvo = W[:D, woff:woff + D]                     # pre-folded Wv @ Wo
        w1 = W[:D, woff + D:woff + D + F]
        w2 = W[:F, woff + D + F:woff + D + F + D]
        bvo = V[voff + 0:voff + 1, :D]                 # pre-folded bv @ Wo + bo
        g1 = V[voff + 1:voff + 2, :D]
        be1 = V[voff + 2:voff + 3, :D]
        b1 = V[voff + 3:voff + 4, :F]
        b2 = V[voff + 4:voff + 5, :D]
        g2 = V[voff + 5:voff + 6, :D]
        be2 = V[voff + 6:voff + 7, :D]

        # MultiHeadAttention with seq_len == 1: softmax over a single key is exactly 1.0,
        # so attn_output == value path through the output projection (Q/K can't change it);
        # the two projections are folded into the single matmul below.
        attn = jnp.dot(h, wvo, preferred_element_type=jnp.float32) + bvo
        h = _layernorm(h + attn, g1, be1)              # norm1

        f = jnp.dot(h, w1, preferred_element_type=jnp.float32) + b1
        f = _gelu_tanh(f)
        f = jnp.dot(f, w2, preferred_element_type=jnp.float32) + b2
        h = _layernorm(h + f, g2, be2)                 # norm2

    # behavior_embeddings[:, -1, :] with seq_len == 1, then squeeze(1) -> [B, D]
    out_ref[...] = h


def init_params(key):
    ks = jax.random.split(key, 12)

    def w(k, shape, scale=0.05):
        return jax.random.normal(k, shape, jnp.float32) * scale

    return {
        # SimpleTextEncoder embedding table (the LSTM is never used in forward)
        "embedding": w(ks[0], (VOCAB, EMBED_DIM), 1.0),
        "proj_w": w(ks[1], (EMBED_DIM, EMBED_DIM)),
        "proj_b": w(ks[2], (1, EMBED_DIM)),
        "wv": w(ks[3], (NUM_LAYERS, EMBED_DIM, EMBED_DIM)),
        "bv": w(ks[4], (NUM_LAYERS, 1, EMBED_DIM)),
        "wo": w(ks[5], (NUM_LAYERS, EMBED_DIM, EMBED_DIM)),
        "bo": w(ks[6], (NUM_LAYERS, 1, EMBED_DIM)),
        "g1": jnp.ones((NUM_LAYERS, 1, EMBED_DIM), jnp.float32),
        "be1": jnp.zeros((NUM_LAYERS, 1, EMBED_DIM), jnp.float32),
        "g2": jnp.ones((NUM_LAYERS, 1, EMBED_DIM), jnp.float32),
        "be2": jnp.zeros((NUM_LAYERS, 1, EMBED_DIM), jnp.float32),
        "w1": w(ks[7], (NUM_LAYERS, EMBED_DIM, FF_DIM)),
        "b1": w(ks[8], (NUM_LAYERS, 1, FF_DIM)),
        "w2": w(ks[9], (NUM_LAYERS, FF_DIM, EMBED_DIM)),
        "b2": w(ks[10], (NUM_LAYERS, 1, EMBED_DIM)),
    }


def pack_params(params):
    """Fold Wv@Wo per layer (in f32) and pack all weights / vectors into two slabs."""
    D, F, L = EMBED_DIM, FF_DIM, NUM_LAYERS
    W = jnp.zeros((W_ROWS, W_COLS), jnp.float32)
    V = jnp.zeros((V_ROWS, V_COLS), jnp.float32)

    W = W.at[:D, 0:D].set(params["proj_w"])
    V = V.at[0, :D].set(params["proj_b"][0])

    for l in range(L):
        wvo = params["wv"][l] @ params["wo"][l]                         # [D, D], f32 fold
        bvo = params["bv"][l] @ params["wo"][l] + params["bo"][l]       # [1, D]
        woff = D + l * LAYER_W_COLS
        voff = 1 + l * LAYER_V_ROWS
        W = W.at[:D, woff:woff + D].set(wvo)
        W = W.at[:D, woff + D:woff + D + F].set(params["w1"][l])
        W = W.at[:F, woff + D + F:woff + D + F + D].set(params["w2"][l])
        V = V.at[voff + 0, :D].set(bvo[0])
        V = V.at[voff + 1, :D].set(params["g1"][l, 0])
        V = V.at[voff + 2, :D].set(params["be1"][l, 0])
        V = V.at[voff + 3, :F].set(params["b1"][l, 0])
        V = V.at[voff + 4, :D].set(params["b2"][l, 0])
        V = V.at[voff + 5, :D].set(params["g2"][l, 0])
        V = V.at[voff + 6, :D].set(params["be2"][l, 0])
    return W, V


def bahe_forward(word_ids, emb_table, w_slab, v_slab):
    # TODO(synk): the original hashes Python strings (ALBERT tokenizer) to ids; strings have
    # no Pallas/JAX equivalent, so precomputed integer word ids stand in for the tokenizer.
    ids = word_ids.reshape(BATCH, TW).astype(jnp.int32)
    vmem = pl.BlockSpec(memory_space=pltpu.MemorySpace.VMEM)
    return pl.pallas_call(
        bahe_kernel,
        out_shape=jax.ShapeDtypeStruct((BATCH, EMBED_DIM), jnp.float32),
        in_specs=[vmem, vmem, vmem, vmem],
        out_specs=vmem,
        # Gridless on purpose: all operands (~80 KiB) are VMEM-resident; a grid would only
        # add pipeline overhead at this size.  Add a parallel batch grid if BATCH scales.
    )(ids, emb_table.astype(jnp.float32), w_slab, v_slab)


if __name__ == "__main__":
    key = jax.random.PRNGKey(0)
    k_param, k_ids = jax.random.split(key)

    params = init_params(k_param)
    w_slab, v_slab = pack_params(params)

    # stand-in for behavior_texts: hashed word ids per (user, text, word)
    word_ids = jax.random.randint(k_ids, (BATCH, NUM_TEXTS, NUM_WORDS), 0, VOCAB)

    out = bahe_forward(word_ids, params["embedding"], w_slab, v_slab)
    out = jax.block_until_ready(out)
    assert out.shape == (BATCH, EMBED_DIM)
    assert bool(jnp.all(jnp.isfinite(out)))
    print("KERNEL_OK")
</pallas_src>

<mosaic_0001>
module attributes {stable_mosaic.version = 11 : i64} {
  func.func @bahe_kernel(%arg0: memref<8x15xi32, #tpu.memory_space<vmem>>, %arg1: memref<100x32xf32, #tpu.memory_space<vmem>>, %arg2: memref<64x288xf32, #tpu.memory_space<vmem>>, %arg3: memref<15x64xf32, #tpu.memory_space<vmem>>, %arg4: memref<8x32xf32, #tpu.memory_space<vmem>>) attributes {dimension_semantics = [], scalar_prefetch = 0 : i64, scratch_operands = 0 : i64, tpu.core_type = #tpu.core_type<tc>} {
    %c0 = arith.constant 0 : index
    %c0_0 = arith.constant 0 : index
    %0 = vector.load %arg0[%c0, %c0_0] : memref<8x15xi32, #tpu.memory_space<vmem>>, vector<8x15xi32>
    %c0_1 = arith.constant 0 : index
    %c0_2 = arith.constant 0 : index
    %1 = vector.load %arg1[%c0_1, %c0_2] : memref<100x32xf32, #tpu.memory_space<vmem>>, vector<100x32xf32>
    %c0_3 = arith.constant 0 : index
    %c0_4 = arith.constant 0 : index
    %2 = vector.load %arg2[%c0_3, %c0_4] : memref<64x288xf32, #tpu.memory_space<vmem>>, vector<64x288xf32>
    %c0_5 = arith.constant 0 : index
    %c0_6 = arith.constant 0 : index
    %3 = vector.load %arg3[%c0_5, %c0_6] : memref<15x64xf32, #tpu.memory_space<vmem>>, vector<15x64xf32>
    %4 = tpu.iota {dimensions = array<i32: 1>} : vector<8x100xi32>
    %cst = arith.constant 0.000000e+00 : f32
    %5 = vector.broadcast %cst : f32 to vector<8x100xf32>
    %6 = vector.extract_strided_slice %0 {offsets = [0, 0], sizes = [8, 1], strides = [1, 1]} : vector<8x15xi32> to vector<8x1xi32>
    %7 = vector.broadcast %6 : vector<8x1xi32> to vector<8x100xi32>
    %8 = arith.cmpi eq, %7, %4 : vector<8x100xi32>
    %9 = arith.extui %8 : vector<8x100xi1> to vector<8x100xi32>
    %10 = arith.sitofp %9 : vector<8x100xi32> to vector<8x100xf32>
    %11 = arith.addf %5, %10 : vector<8x100xf32>
    %12 = vector.extract_strided_slice %0 {offsets = [0, 1], sizes = [8, 1], strides = [1, 1]} : vector<8x15xi32> to vector<8x1xi32>
    %13 = vector.broadcast %12 : vector<8x1xi32> to vector<8x100xi32>
    %14 = arith.cmpi eq, %13, %4 : vector<8x100xi32>
    %15 = arith.extui %14 : vector<8x100xi1> to vector<8x100xi32>
    %16 = arith.sitofp %15 : vector<8x100xi32> to vector<8x100xf32>
    %17 = arith.addf %11, %16 : vector<8x100xf32>
    %18 = vector.extract_strided_slice %0 {offsets = [0, 2], sizes = [8, 1], strides = [1, 1]} : vector<8x15xi32> to vector<8x1xi32>
    %19 = vector.broadcast %18 : vector<8x1xi32> to vector<8x100xi32>
    %20 = arith.cmpi eq, %19, %4 : vector<8x100xi32>
    %21 = arith.extui %20 : vector<8x100xi1> to vector<8x100xi32>
    %22 = arith.sitofp %21 : vector<8x100xi32> to vector<8x100xf32>
    %23 = arith.addf %17, %22 : vector<8x100xf32>
    %24 = vector.extract_strided_slice %0 {offsets = [0, 3], sizes = [8, 1], strides = [1, 1]} : vector<8x15xi32> to vector<8x1xi32>
    %25 = vector.broadcast %24 : vector<8x1xi32> to vector<8x100xi32>
    %26 = arith.cmpi eq, %25, %4 : vector<8x100xi32>
    %27 = arith.extui %26 : vector<8x100xi1> to vector<8x100xi32>
    %28 = arith.sitofp %27 : vector<8x100xi32> to vector<8x100xf32>
    %29 = arith.addf %23, %28 : vector<8x100xf32>
    %30 = vector.extract_strided_slice %0 {offsets = [0, 4], sizes = [8, 1], strides = [1, 1]} : vector<8x15xi32> to vector<8x1xi32>
    %31 = vector.broadcast %30 : vector<8x1xi32> to vector<8x100xi32>
    %32 = arith.cmpi eq, %31, %4 : vector<8x100xi32>
    %33 = arith.extui %32 : vector<8x100xi1> to vector<8x100xi32>
    %34 = arith.sitofp %33 : vector<8x100xi32> to vector<8x100xf32>
    %35 = arith.addf %29, %34 : vector<8x100xf32>
    %36 = vector.extract_strided_slice %0 {offsets = [0, 5], sizes = [8, 1], strides = [1, 1]} : vector<8x15xi32> to vector<8x1xi32>
    %37 = vector.broadcast %36 : vector<8x1xi32> to vector<8x100xi32>
    %38 = arith.cmpi eq, %37, %4 : vector<8x100xi32>
    %39 = arith.extui %38 : vector<8x100xi1> to vector<8x100xi32>
    %40 = arith.sitofp %39 : vector<8x100xi32> to vector<8x100xf32>
    %41 = arith.addf %35, %40 : vector<8x100xf32>
    %42 = vector.extract_strided_slice %0 {offsets = [0, 6], sizes = [8, 1], strides = [1, 1]} : vector<8x15xi32> to vector<8x1xi32>
    %43 = vector.broadcast %42 : vector<8x1xi32> to vector<8x100xi32>
    %44 = arith.cmpi eq, %43, %4 : vector<8x100xi32>
    %45 = arith.extui %44 : vector<8x100xi1> to vector<8x100xi32>
    %46 = arith.sitofp %45 : vector<8x100xi32> to vector<8x100xf32>
    %47 = arith.addf %41, %46 : vector<8x100xf32>
    %48 = vector.extract_strided_slice %0 {offsets = [0, 7], sizes = [8, 1], strides = [1, 1]} : vector<8x15xi32> to vector<8x1xi32>
    %49 = vector.broadcast %48 : vector<8x1xi32> to vector<8x100xi32>
    %50 = arith.cmpi eq, %49, %4 : vector<8x100xi32>
    %51 = arith.extui %50 : vector<8x100xi1> to vector<8x100xi32>
    %52 = arith.sitofp %51 : vector<8x100xi32> to vector<8x100xf32>
    %53 = arith.addf %47, %52 : vector<8x100xf32>
    %54 = vector.extract_strided_slice %0 {offsets = [0, 8], sizes = [8, 1], strides = [1, 1]} : vector<8x15xi32> to vector<8x1xi32>
    %55 = vector.broadcast %54 : vector<8x1xi32> to vector<8x100xi32>
    %56 = arith.cmpi eq, %55, %4 : vector<8x100xi32>
    %57 = arith.extui %56 : vector<8x100xi1> to vector<8x100xi32>
    %58 = arith.sitofp %57 : vector<8x100xi32> to vector<8x100xf32>
    %59 = arith.addf %53, %58 : vector<8x100xf32>
    %60 = vector.extract_strided_slice %0 {offsets = [0, 9], sizes = [8, 1], strides = [1, 1]} : vector<8x15xi32> to vector<8x1xi32>
    %61 = vector.broadcast %60 : vector<8x1xi32> to vector<8x100xi32>
    %62 = arith.cmpi eq, %61, %4 : vector<8x100xi32>
    %63 = arith.extui %62 : vector<8x100xi1> to vector<8x100xi32>
    %64 = arith.sitofp %63 : vector<8x100xi32> to vector<8x100xf32>
    %65 = arith.addf %59, %64 : vector<8x100xf32>
    %66 = vector.extract_strided_slice %0 {offsets = [0, 10], sizes = [8, 1], strides = [1, 1]} : vector<8x15xi32> to vector<8x1xi32>
    %67 = vector.broadcast %66 : vector<8x1xi32> to vector<8x100xi32>
    %68 = arith.cmpi eq, %67, %4 : vector<8x100xi32>
    %69 = arith.extui %68 : vector<8x100xi1> to vector<8x100xi32>
    %70 = arith.sitofp %69 : vector<8x100xi32> to vector<8x100xf32>
    %71 = arith.addf %65, %70 : vector<8x100xf32>
    %72 = vector.extract_strided_slice %0 {offsets = [0, 11], sizes = [8, 1], strides = [1, 1]} : vector<8x15xi32> to vector<8x1xi32>
    %73 = vector.broadcast %72 : vector<8x1xi32> to vector<8x100xi32>
    %74 = arith.cmpi eq, %73, %4 : vector<8x100xi32>
    %75 = arith.extui %74 : vector<8x100xi1> to vector<8x100xi32>
    %76 = arith.sitofp %75 : vector<8x100xi32> to vector<8x100xf32>
    %77 = arith.addf %71, %76 : vector<8x100xf32>
    %78 = vector.extract_strided_slice %0 {offsets = [0, 12], sizes = [8, 1], strides = [1, 1]} : vector<8x15xi32> to vector<8x1xi32>
    %79 = vector.broadcast %78 : vector<8x1xi32> to vector<8x100xi32>
    %80 = arith.cmpi eq, %79, %4 : vector<8x100xi32>
    %81 = arith.extui %80 : vector<8x100xi1> to vector<8x100xi32>
    %82 = arith.sitofp %81 : vector<8x100xi32> to vector<8x100xf32>
    %83 = arith.addf %77, %82 : vector<8x100xf32>
    %84 = vector.extract_strided_slice %0 {offsets = [0, 13], sizes = [8, 1], strides = [1, 1]} : vector<8x15xi32> to vector<8x1xi32>
    %85 = vector.broadcast %84 : vector<8x1xi32> to vector<8x100xi32>
    %86 = arith.cmpi eq, %85, %4 : vector<8x100xi32>
    %87 = arith.extui %86 : vector<8x100xi1> to vector<8x100xi32>
    %88 = arith.sitofp %87 : vector<8x100xi32> to vector<8x100xf32>
    %89 = arith.addf %83, %88 : vector<8x100xf32>
    %90 = vector.extract_strided_slice %0 {offsets = [0, 14], sizes = [8, 1], strides = [1, 1]} : vector<8x15xi32> to vector<8x1xi32>
    %91 = vector.broadcast %90 : vector<8x1xi32> to vector<8x100xi32>
    %92 = arith.cmpi eq, %91, %4 : vector<8x100xi32>
    %93 = arith.extui %92 : vector<8x100xi1> to vector<8x100xi32>
    %94 = arith.sitofp %93 : vector<8x100xi32> to vector<8x100xf32>
    %95 = arith.addf %89, %94 : vector<8x100xf32>
    %cst_7 = arith.constant 0.0666666701 : f32
    %96 = vector.broadcast %cst_7 : f32 to vector<8x100xf32>
    %97 = arith.mulf %95, %96 : vector<8x100xf32>
    %cst_8 = arith.constant dense<0.000000e+00> : vector<8x32xf32>
    %98 = tpu.matmul %97, %1, %cst_8 {dimension_numbers = #tpu.dot_dimension_numbers<[1], [0], [0], [1], [0, 0, 1, 1], [], []>} : vector<8x100xf32>, vector<100x32xf32>, vector<8x32xf32> -> vector<8x32xf32>
    %99 = vector.extract_strided_slice %2 {offsets = [0, 0], sizes = [32, 32], strides = [1, 1]} : vector<64x288xf32> to vector<32x32xf32>
    %cst_9 = arith.constant dense<0.000000e+00> : vector<8x32xf32>
    %100 = tpu.matmul %98, %99, %cst_9 {dimension_numbers = #tpu.dot_dimension_numbers<[1], [0], [0], [1], [0, 0, 1, 1], [], []>} : vector<8x32xf32>, vector<32x32xf32>, vector<8x32xf32> -> vector<8x32xf32>
    %101 = vector.extract_strided_slice %3 {offsets = [0, 0], sizes = [1, 32], strides = [1, 1]} : vector<15x64xf32> to vector<1x32xf32>
    %102 = vector.broadcast %101 : vector<1x32xf32> to vector<8x32xf32>
    %103 = arith.addf %100, %102 : vector<8x32xf32>
    %104 = vector.extract_strided_slice %2 {offsets = [0, 32], sizes = [32, 32], strides = [1, 1]} : vector<64x288xf32> to vector<32x32xf32>
    %105 = vector.extract_strided_slice %2 {offsets = [0, 64], sizes = [32, 64], strides = [1, 1]} : vector<64x288xf32> to vector<32x64xf32>
    %106 = vector.extract_strided_slice %2 {offsets = [0, 128], sizes = [64, 32], strides = [1, 1]} : vector<64x288xf32> to vector<64x32xf32>
    %107 = vector.extract_strided_slice %3 {offsets = [1, 0], sizes = [1, 32], strides = [1, 1]} : vector<15x64xf32> to vector<1x32xf32>
    %108 = vector.extract_strided_slice %3 {offsets = [2, 0], sizes = [1, 32], strides = [1, 1]} : vector<15x64xf32> to vector<1x32xf32>
    %109 = vector.extract_strided_slice %3 {offsets = [3, 0], sizes = [1, 32], strides = [1, 1]} : vector<15x64xf32> to vector<1x32xf32>
    %110 = vector.extract_strided_slice %3 {offsets = [4, 0], sizes = [1, 64], strides = [1, 1]} : vector<15x64xf32> to vector<1x64xf32>
    %111 = vector.extract_strided_slice %3 {offsets = [5, 0], sizes = [1, 32], strides = [1, 1]} : vector<15x64xf32> to vector<1x32xf32>
    %112 = vector.extract_strided_slice %3 {offsets = [6, 0], sizes = [1, 32], strides = [1, 1]} : vector<15x64xf32> to vector<1x32xf32>
    %113 = vector.extract_strided_slice %3 {offsets = [7, 0], sizes = [1, 32], strides = [1, 1]} : vector<15x64xf32> to vector<1x32xf32>
    %cst_10 = arith.constant dense<0.000000e+00> : vector<8x32xf32>
    %114 = tpu.matmul %103, %104, %cst_10 {dimension_numbers = #tpu.dot_dimension_numbers<[1], [0], [0], [1], [0, 0, 1, 1], [], []>} : vector<8x32xf32>, vector<32x32xf32>, vector<8x32xf32> -> vector<8x32xf32>
    %115 = vector.broadcast %107 : vector<1x32xf32> to vector<8x32xf32>
    %116 = arith.addf %114, %115 : vector<8x32xf32>
    %117 = arith.addf %103, %116 : vector<8x32xf32>
    %cst_11 = arith.constant dense<0.000000e+00> : vector<8xf32>
    %118 = vector.multi_reduction <add>, %117, %cst_11 [1] : vector<8x32xf32> to vector<8xf32>
    %119 = vector.shape_cast %118 : vector<8xf32> to vector<8x1xf32>
    %cst_12 = arith.constant 3.200000e+01 : f32
    %120 = vector.broadcast %cst_12 : f32 to vector<8x1xf32>
    %121 = arith.divf %119, %120 : vector<8x1xf32>
    %122 = vector.broadcast %121 : vector<8x1xf32> to vector<8x32xf32>
    %123 = arith.subf %117, %122 : vector<8x32xf32>
    %124 = arith.mulf %123, %123 : vector<8x32xf32>
    %cst_13 = arith.constant dense<0.000000e+00> : vector<8xf32>
    %125 = vector.multi_reduction <add>, %124, %cst_13 [1] : vector<8x32xf32> to vector<8xf32>
    %126 = vector.shape_cast %125 : vector<8xf32> to vector<8x1xf32>
    %cst_14 = arith.constant 3.200000e+01 : f32
    %127 = vector.broadcast %cst_14 : f32 to vector<8x1xf32>
    %128 = arith.divf %126, %127 : vector<8x1xf32>
    %129 = vector.broadcast %121 : vector<8x1xf32> to vector<8x32xf32>
    %130 = arith.subf %117, %129 : vector<8x32xf32>
    %cst_15 = arith.constant 9.99999974E-6 : f32
    %131 = vector.broadcast %cst_15 : f32 to vector<8x1xf32>
    %132 = arith.addf %128, %131 : vector<8x1xf32>
    %133 = math.rsqrt %132 : vector<8x1xf32>
    %134 = vector.broadcast %133 : vector<8x1xf32> to vector<8x32xf32>
    %135 = arith.mulf %130, %134 : vector<8x32xf32>
    %136 = vector.broadcast %108 : vector<1x32xf32> to vector<8x32xf32>
    %137 = arith.mulf %135, %136 : vector<8x32xf32>
    %138 = vector.broadcast %109 : vector<1x32xf32> to vector<8x32xf32>
    %139 = arith.addf %137, %138 : vector<8x32xf32>
    %cst_16 = arith.constant dense<0.000000e+00> : vector<8x64xf32>
    %140 = tpu.matmul %139, %105, %cst_16 {dimension_numbers = #tpu.dot_dimension_numbers<[1], [0], [0], [1], [0, 0, 1, 1], [], []>} : vector<8x32xf32>, vector<32x64xf32>, vector<8x64xf32> -> vector<8x64xf32>
    %141 = vector.broadcast %110 : vector<1x64xf32> to vector<8x64xf32>
    %142 = arith.addf %140, %141 : vector<8x64xf32>
    %cst_17 = arith.constant 5.000000e-01 : f32
    %143 = vector.broadcast %cst_17 : f32 to vector<8x64xf32>
    %144 = arith.mulf %143, %142 : vector<8x64xf32>
    %cst_18 = arith.constant 4.471500e-02 : f32
    %145 = vector.broadcast %cst_18 : f32 to vector<8x64xf32>
    %146 = arith.mulf %145, %142 : vector<8x64xf32>
    %147 = arith.mulf %146, %142 : vector<8x64xf32>
    %148 = arith.mulf %147, %142 : vector<8x64xf32>
    %149 = arith.addf %142, %148 : vector<8x64xf32>
    %cst_19 = arith.constant 0.797884583 : f32
    %150 = vector.broadcast %cst_19 : f32 to vector<8x64xf32>
    %151 = arith.mulf %150, %149 : vector<8x64xf32>
    %152 = math.tanh %151 : vector<8x64xf32>
    %cst_20 = arith.constant 1.000000e+00 : f32
    %153 = vector.broadcast %cst_20 : f32 to vector<8x64xf32>
    %154 = arith.addf %153, %152 : vector<8x64xf32>
    %155 = arith.mulf %144, %154 : vector<8x64xf32>
    %cst_21 = arith.constant dense<0.000000e+00> : vector<8x32xf32>
    %156 = tpu.matmul %155, %106, %cst_21 {dimension_numbers = #tpu.dot_dimension_numbers<[1], [0], [0], [1], [0, 0, 1, 1], [], []>} : vector<8x64xf32>, vector<64x32xf32>, vector<8x32xf32> -> vector<8x32xf32>
    %157 = vector.broadcast %111 : vector<1x32xf32> to vector<8x32xf32>
    %158 = arith.addf %156, %157 : vector<8x32xf32>
    %159 = arith.addf %139, %158 : vector<8x32xf32>
    %cst_22 = arith.constant dense<0.000000e+00> : vector<8xf32>
    %160 = vector.multi_reduction <add>, %159, %cst_22 [1] : vector<8x32xf32> to vector<8xf32>
    %161 = vector.shape_cast %160 : vector<8xf32> to vector<8x1xf32>
    %cst_23 = arith.constant 3.200000e+01 : f32
    %162 = vector.broadcast %cst_23 : f32 to vector<8x1xf32>
    %163 = arith.divf %161, %162 : vector<8x1xf32>
    %164 = vector.broadcast %163 : vector<8x1xf32> to vector<8x32xf32>
    %165 = arith.subf %159, %164 : vector<8x32xf32>
    %166 = arith.mulf %165, %165 : vector<8x32xf32>
    %cst_24 = arith.constant dense<0.000000e+00> : vector<8xf32>
    %167 = vector.multi_reduction <add>, %166, %cst_24 [1] : vector<8x32xf32> to vector<8xf32>
    %168 = vector.shape_cast %167 : vector<8xf32> to vector<8x1xf32>
    %cst_25 = arith.constant 3.200000e+01 : f32
    %169 = vector.broadcast %cst_25 : f32 to vector<8x1xf32>
    %170 = arith.divf %168, %169 : vector<8x1xf32>
    %171 = vector.broadcast %163 : vector<8x1xf32> to vector<8x32xf32>
    %172 = arith.subf %159, %171 : vector<8x32xf32>
    %cst_26 = arith.constant 9.99999974E-6 : f32
    %173 = vector.broadcast %cst_26 : f32 to vector<8x1xf32>
    %174 = arith.addf %170, %173 : vector<8x1xf32>
    %175 = math.rsqrt %174 : vector<8x1xf32>
    %176 = vector.broadcast %175 : vector<8x1xf32> to vector<8x32xf32>
    %177 = arith.mulf %172, %176 : vector<8x32xf32>
    %178 = vector.broadcast %112 : vector<1x32xf32> to vector<8x32xf32>
    %179 = arith.mulf %177, %178 : vector<8x32xf32>
    %180 = vector.broadcast %113 : vector<1x32xf32> to vector<8x32xf32>
    %181 = arith.addf %179, %180 : vector<8x32xf32>
    %182 = vector.extract_strided_slice %2 {offsets = [0, 160], sizes = [32, 32], strides = [1, 1]} : vector<64x288xf32> to vector<32x32xf32>
    %183 = vector.extract_strided_slice %2 {offsets = [0, 192], sizes = [32, 64], strides = [1, 1]} : vector<64x288xf32> to vector<32x64xf32>
    %184 = vector.extract_strided_slice %2 {offsets = [0, 256], sizes = [64, 32], strides = [1, 1]} : vector<64x288xf32> to vector<64x32xf32>
    %185 = vector.extract_strided_slice %3 {offsets = [8, 0], sizes = [1, 32], strides = [1, 1]} : vector<15x64xf32> to vector<1x32xf32>
    %186 = vector.extract_strided_slice %3 {offsets = [9, 0], sizes = [1, 32], strides = [1, 1]} : vector<15x64xf32> to vector<1x32xf32>
    %187 = vector.extract_strided_slice %3 {offsets = [10, 0], sizes = [1, 32], strides = [1, 1]} : vector<15x64xf32> to vector<1x32xf32>
    %188 = vector.extract_strided_slice %3 {offsets = [11, 0], sizes = [1, 64], strides = [1, 1]} : vector<15x64xf32> to vector<1x64xf32>
    %189 = vector.extract_strided_slice %3 {offsets = [12, 0], sizes = [1, 32], strides = [1, 1]} : vector<15x64xf32> to vector<1x32xf32>
    %190 = vector.extract_strided_slice %3 {offsets = [13, 0], sizes = [1, 32], strides = [1, 1]} : vector<15x64xf32> to vector<1x32xf32>
    %191 = vector.extract_strided_slice %3 {offsets = [14, 0], sizes = [1, 32], strides = [1, 1]} : vector<15x64xf32> to vector<1x32xf32>
    %cst_27 = arith.constant dense<0.000000e+00> : vector<8x32xf32>
    %192 = tpu.matmul %181, %182, %cst_27 {dimension_numbers = #tpu.dot_dimension_numbers<[1], [0], [0], [1], [0, 0, 1, 1], [], []>} : vector<8x32xf32>, vector<32x32xf32>, vector<8x32xf32> -> vector<8x32xf32>
    %193 = vector.broadcast %185 : vector<1x32xf32> to vector<8x32xf32>
    %194 = arith.addf %192, %193 : vector<8x32xf32>
    %195 = arith.addf %181, %194 : vector<8x32xf32>
    %cst_28 = arith.constant dense<0.000000e+00> : vector<8xf32>
    %196 = vector.multi_reduction <add>, %195, %cst_28 [1] : vector<8x32xf32> to vector<8xf32>
    %197 = vector.shape_cast %196 : vector<8xf32> to vector<8x1xf32>
    %cst_29 = arith.constant 3.200000e+01 : f32
    %198 = vector.broadcast %cst_29 : f32 to vector<8x1xf32>
    %199 = arith.divf %197, %198 : vector<8x1xf32>
    %200 = vector.broadcast %199 : vector<8x1xf32> to vector<8x32xf32>
    %201 = arith.subf %195, %200 : vector<8x32xf32>
    %202 = arith.mulf %201, %201 : vector<8x32xf32>
    %cst_30 = arith.constant dense<0.000000e+00> : vector<8xf32>
    %203 = vector.multi_reduction <add>, %202, %cst_30 [1] : vector<8x32xf32> to vector<8xf32>
    %204 = vector.shape_cast %203 : vector<8xf32> to vector<8x1xf32>
    %cst_31 = arith.constant 3.200000e+01 : f32
    %205 = vector.broadcast %cst_31 : f32 to vector<8x1xf32>
    %206 = arith.divf %204, %205 : vector<8x1xf32>
    %207 = vector.broadcast %199 : vector<8x1xf32> to vector<8x32xf32>
    %208 = arith.subf %195, %207 : vector<8x32xf32>
    %cst_32 = arith.constant 9.99999974E-6 : f32
    %209 = vector.broadcast %cst_32 : f32 to vector<8x1xf32>
    %210 = arith.addf %206, %209 : vector<8x1xf32>
    %211 = math.rsqrt %210 : vector<8x1xf32>
    %212 = vector.broadcast %211 : vector<8x1xf32> to vector<8x32xf32>
    %213 = arith.mulf %208, %212 : vector<8x32xf32>
    %214 = vector.broadcast %186 : vector<1x32xf32> to vector<8x32xf32>
    %215 = arith.mulf %213, %214 : vector<8x32xf32>
    %216 = vector.broadcast %187 : vector<1x32xf32> to vector<8x32xf32>
    %217 = arith.addf %215, %216 : vector<8x32xf32>
    %cst_33 = arith.constant dense<0.000000e+00> : vector<8x64xf32>
    %218 = tpu.matmul %217, %183, %cst_33 {dimension_numbers = #tpu.dot_dimension_numbers<[1], [0], [0], [1], [0, 0, 1, 1], [], []>} : vector<8x32xf32>, vector<32x64xf32>, vector<8x64xf32> -> vector<8x64xf32>
    %219 = vector.broadcast %188 : vector<1x64xf32> to vector<8x64xf32>
    %220 = arith.addf %218, %219 : vector<8x64xf32>
    %cst_34 = arith.constant 5.000000e-01 : f32
    %221 = vector.broadcast %cst_34 : f32 to vector<8x64xf32>
    %222 = arith.mulf %221, %220 : vector<8x64xf32>
    %cst_35 = arith.constant 4.471500e-02 : f32
    %223 = vector.broadcast %cst_35 : f32 to vector<8x64xf32>
    %224 = arith.mulf %223, %220 : vector<8x64xf32>
    %225 = arith.mulf %224, %220 : vector<8x64xf32>
    %226 = arith.mulf %225, %220 : vector<8x64xf32>
    %227 = arith.addf %220, %226 : vector<8x64xf32>
    %cst_36 = arith.constant 0.797884583 : f32
    %228 = vector.broadcast %cst_36 : f32 to vector<8x64xf32>
    %229 = arith.mulf %228, %227 : vector<8x64xf32>
    %230 = math.tanh %229 : vector<8x64xf32>
    %cst_37 = arith.constant 1.000000e+00 : f32
    %231 = vector.broadcast %cst_37 : f32 to vector<8x64xf32>
    %232 = arith.addf %231, %230 : vector<8x64xf32>
    %233 = arith.mulf %222, %232 : vector<8x64xf32>
    %cst_38 = arith.constant dense<0.000000e+00> : vector<8x32xf32>
    %234 = tpu.matmul %233, %184, %cst_38 {dimension_numbers = #tpu.dot_dimension_numbers<[1], [0], [0], [1], [0, 0, 1, 1], [], []>} : vector<8x64xf32>, vector<64x32xf32>, vector<8x32xf32> -> vector<8x32xf32>
    %235 = vector.broadcast %189 : vector<1x32xf32> to vector<8x32xf32>
    %236 = arith.addf %234, %235 : vector<8x32xf32>
    %237 = arith.addf %217, %236 : vector<8x32xf32>
    %cst_39 = arith.constant dense<0.000000e+00> : vector<8xf32>
    %238 = vector.multi_reduction <add>, %237, %cst_39 [1] : vector<8x32xf32> to vector<8xf32>
    %239 = vector.shape_cast %238 : vector<8xf32> to vector<8x1xf32>
    %cst_40 = arith.constant 3.200000e+01 : f32
    %240 = vector.broadcast %cst_40 : f32 to vector<8x1xf32>
    %241 = arith.divf %239, %240 : vector<8x1xf32>
    %242 = vector.broadcast %241 : vector<8x1xf32> to vector<8x32xf32>
    %243 = arith.subf %237, %242 : vector<8x32xf32>
    %244 = arith.mulf %243, %243 : vector<8x32xf32>
    %cst_41 = arith.constant dense<0.000000e+00> : vector<8xf32>
    %245 = vector.multi_reduction <add>, %244, %cst_41 [1] : vector<8x32xf32> to vector<8xf32>
    %246 = vector.shape_cast %245 : vector<8xf32> to vector<8x1xf32>
    %cst_42 = arith.constant 3.200000e+01 : f32
    %247 = vector.broadcast %cst_42 : f32 to vector<8x1xf32>
    %248 = arith.divf %246, %247 : vector<8x1xf32>
    %249 = vector.broadcast %241 : vector<8x1xf32> to vector<8x32xf32>
    %250 = arith.subf %237, %249 : vector<8x32xf32>
    %cst_43 = arith.constant 9.99999974E-6 : f32
    %251 = vector.broadcast %cst_43 : f32 to vector<8x1xf32>
    %252 = arith.addf %248, %251 : vector<8x1xf32>
    %253 = math.rsqrt %252 : vector<8x1xf32>
    %254 = vector.broadcast %253 : vector<8x1xf32> to vector<8x32xf32>
    %255 = arith.mulf %250, %254 : vector<8x32xf32>
    %256 = vector.broadcast %190 : vector<1x32xf32> to vector<8x32xf32>
    %257 = arith.mulf %255, %256 : vector<8x32xf32>
    %258 = vector.broadcast %191 : vector<1x32xf32> to vector<8x32xf32>
    %259 = arith.addf %257, %258 : vector<8x32xf32>
    %c0_44 = arith.constant 0 : index
    %c0_45 = arith.constant 0 : index
    %260 = vector.load %arg4[%c0_44, %c0_45] : memref<8x32xf32, #tpu.memory_space<vmem>>, vector<8x32xf32>
    tpu.vector_store %arg4[%c0_44, %c0_45], %259 {strides = array<i32>} : memref<8x32xf32, #tpu.memory_space<vmem>>, vector<8x32xf32>,
    return
  }
}

</mosaic_0001>

<bundles_post_ra>
// kernel: tpu_custom_call.1
= control target key start
LH: loop header
LB: loop body
LE: loop exit
PB: predicated region body
PF: predicated region fallthrough
CT: control target
= control target key end

     0   :  { %9 = vsyncpa [#allocation3], 0  ;;  %s1673_s0 = inlined_call_operand.vmem [shape: s32[8,15], index: 0, kind: input, shape index: {}]   ;;  %s1674_s1 = inlined_call_operand.vmem [shape: f32[100,32], index: 1, kind: input, shape index: {}]   ;;  %s1675_s2 = inlined_call_operand.hbm [shape: f32[64,288], index: 2, kind: input, shape index: {}]   ;;  %s1676_s3 = inlined_call_operand.vmem [shape: f32[15,64], index: 3, kind: input, shape index: {}]   ;;  %s1677_s4 = inlined_call_operand.hbm [shape: f32[8,32], index: 4, kind: output, shape index: {}]  }
   0x1   :  { %10 = vsyncpa [#allocation4], 0  ;;  %s1396_s15 = smov [#allocation2]   ;;  %s1348_s19 = scalar_lea.hbm %s1675_s2, 3072 }
   0x2   :  { %s20_s16 = sshll.u32 %s1396_s15, 4  ;;  %p1349_p0 = scmp.ne.s32.totalorder %s1675_s2, %s1348_s19  ;;  %s21_s16 = int_to_ptr.vmem [resolvable:$true] %s20_s16 }
   0x3   :  { %p1352_p1 = scmp.lt.u32.totalorder %s1348_s19, %s1675_s2 }
   0x5   :  { %p1354_p2 = pnand %p1352_p1, %p1349_p0 }
   0x7   :  { %1357 = shalt.err (!%p1354_p2)
}
   0x8   :  { %s1358_s24 = scalar_lea.vmem %s21_s16, 3072  ;;  %p1363_p4 = scmp.lt.s32.totalorder %s21_s16, %s21_s16 }
   0x9   :  { %p1359_p3 = scmp.ne.s32.totalorder %s21_s16, %s1358_s24  ;;  %p1364_p5 = scmp.lt.s32.totalorder %s1358_s24, %s1358_s24 }
   0xb   :  { %p1365_p6 = por %p1364_p5, %p1363_p4 }
   0xd   :  { %p1366_p7 = pnand %p1365_p6, %p1359_p3 }
   0xf   :  { %1369 = shalt.err (!%p1366_p7)
}
  0x10   :  { %s1397_s25 = smov 384   ;;  %s1398_s26 = smov 24  }
  0x11   :  { %26 = dma.hbm_to_vmem [thread:$0]  %s1675_s2, 3072, %s21_s16, [#allocation3], %s1397_s25, %s1397_s25, %s1398_s26  }
  0x12   :  { %1392 = dma.done.wait [#allocation3], 3072  }
  0x13   :  { %1393 = vsyncadd [#allocation3], 4294964224  ;;  %v1399_v0 = vmov 2   ;;  %v1400_v1 = vmov 0   ;;  %v1460_v2 = vld [vmem:[%s1673_s0] sm:$0xff]  ;;  %v1401_v3 = vmov 3   ;;  %v68_v37 = vlaneseq }
  0x14   :  { %1283 = vset.pattern.permute.xlu1 %v1399_v0  ;;  %1281 = vset.pattern.permute.xlu0 %v1400_v1  ;;  %v1402_v4 = vmov 1   ;;  %v1403_v5 = vmov 4   ;;  %v1404_v6 = vmov 5   ;;  %v1405_v7 = vmov 6   ;;  %v33_v11 = vld [vmem:[%s1674_s1] sm:$0xff]  ;;  %v34_v12 = vld [vmem:[%s1674_s1 + $0x8] sm:$0xff] }
  0x15   :  { %85 = vperm.xlu1 %1283, %v1460_v2   ;;  %71 = vperm.xlu0 %1281, %v1460_v2   ;;  %v1406_v8 = vmov 8   ;;  %v1407_v9 = vmov 7   ;;  %v1408_v10 = vmov 11   ;;  %v1186_v13 = vpack.c.bf16 %v34_v12, %v33_v11  ;;  %v35_v17 = vld [vmem:[%s1674_s1 + $0x10] sm:$0xff]  ;;  %v36_v18 = vld [vmem:[%s1674_s1 + $0x18] sm:$0xff]  ;;  %v37_v20 = vld [vmem:[%s1674_s1 + $0x20] sm:$0xff] }
  0x16   :  { %v1409_v14 = vmov 0.0|0.0   ;;  %v1410_v15 = vmov 9   ;;  %v1411_v16 = vmov 14   ;;  %v1189_v19 = vpack.c.bf16 %v36_v18, %v35_v17  ;;  %v38_v21 = vld [vmem:[%s1674_s1 + $0x28] sm:$0xff]  ;;  %v39_v24 = vld [vmem:[%s1674_s1 + $0x30] sm:$0xff]  ;;  %v40_v25 = vld [vmem:[%s1674_s1 + $0x38] sm:$0xff] }
  0x17   :  { %1185 = vmatprep.subr.bf16.mxu0 %v1409_v14  ;;  %1209 = vmatprep.subr.bf16.mxu1 %v1409_v14  ;;  %v1412_v22 = vmov 10   ;;  %v1192_v23 = vpack.c.bf16 %v38_v21, %v37_v20  ;;  %v1195_v26 = vpack.c.bf16 %v40_v25, %v39_v24  ;;  %v1413_v27 = vmov 12   ;;  %v41_v28 = vld [vmem:[%s1674_s1 + $0x40] sm:$0xff]  ;;  %v42_v29 = vld [vmem:[%s1674_s1 + $0x48] sm:$0xff]  ;;  %v43_v32 = vld [vmem:[%s1674_s1 + $0x50] sm:$0xff]  ;;  %s1418_s0 = smov 64  }
  0x18   :  { %1187 = vmatpush3.bf16.msra.mxu0 %v1186_v13  ;;  %v1198_v30 = vpack.c.bf16 %v42_v29, %v41_v28  ;;  %v1414_v31 = vmov 13   ;;  %v44_v33 = vld [vmem:[%s1674_s1 + $0x58] sm:$0xff]  ;;  %v1415_v35 = vmov 0.0   ;;  %v45_v36 = vld [vmem:[%s1674_s1 + $0x60] sm:$0xf]  ;;  %vm180_vm0 = vcmask 1043456  }
  0x19   :  { %1284 = vset.pattern.permute.xlu1 %v1401_v3  ;;  %1282 = vset.pattern.permute.xlu0 %v1402_v4  ;;  %v1201_v34 = vpack.c.bf16 %v44_v33, %v43_v32  ;;  %vm1416_vm1 = vmmov 0   ;;  %v69_v38 = vand.u32 127, %v68_v37  ;;  %v49_v20 = vld [vmem:[#allocation2 + $0x18] sm:$0xff]  ;;  %v52_v24 = vld [vmem:[#allocation2 + $0x30] sm:$0xff]  ;;  %v55_v25 = vld [vmem:[#allocation2 + $0x48] sm:$0xff]  ;;  %s1417_s1 = smov 96  }
  0x1a   :  { %92 = vperm.xlu1 %1284, %v1460_v2   ;;  %78 = vperm.xlu0 %1282, %v1460_v2   ;;  %v1301_v28 = vpack.i.bf16 %v55_v25, %v52_v24 }
  0x1b   :  { %1188 = vmatprep.subr.bf16.mxu0 %v1409_v14  ;;  %1089 = vmatprep.mubr.msk.f32.mxu0 %vm1416_vm1, %v1415_v35 }
  0x1c   :  { %1190 = vmatpush3.bf16.msra.mxu0 %v1189_v19  ;;  %1111 = vmatprep.mubr.msk.f32.mxu1 %vm1416_vm1, %v1415_v35  ;;  %v46_v19 = vld [vmem:[#allocation2] sm:$0xff] }
  0x1d   :  { %1191 = vmatprep.subr.bf16.mxu0 %v1409_v14 }
  0x1e   :  { %1285 = vset.pattern.permute.xlu1 %v1403_v5  ;;  %1286 = vset.pattern.permute.xlu0 %v1404_v6 }
  0x1f   :  { %99 = vperm.xlu1 %1285, %v1460_v2   ;;  %106 = vperm.xlu0 %1286, %v1460_v2  }
  0x20   :  { %1193 = vmatpush3.bf16.msra.mxu0 %v1192_v23 }
  0x21   :  { %1194 = vmatprep.subr.bf16.mxu0 %v1409_v14 }
  0x23   :  { %1287 = vset.pattern.permute.xlu1 %v1405_v7  ;;  %1289 = vset.pattern.permute.xlu0 %v1406_v8 }
  0x24   :  { %113 = vperm.xlu1 %1287, %v1460_v2   ;;  %127 = vperm.xlu0 %1289, %v1460_v2  }
  0x25   :  { %1196 = vmatpush3.bf16.msra.mxu0 %v1195_v26  ;;  %v1207_v26 = vpack.c.bf16 %v55_v25, %v52_v24  ;;  %v62_v24 = vld [vmem:[#allocation2 + $0x98] sm:$0xff]  ;;  %v64_v25 = vld [vmem:[#allocation2 + $0xb0] sm:$0xff] }
  0x26   :  { %1197 = vmatprep.subr.bf16.mxu0 %v1409_v14 }
  0x28   :  { %1288 = vset.pattern.permute.xlu1 %v1407_v9  ;;  %1292 = vset.pattern.permute.xlu0 %v1408_v10 }
  0x29   :  { %120 = vperm.xlu1 %1288, %v1460_v2   ;;  %148 = vperm.xlu0 %1292, %v1460_v2  }
  0x2a   :  { %1199 = vmatpush3.bf16.msra.mxu0 %v1198_v30 }
  0x2b   :  { %1200 = vmatprep.subr.bf16.mxu0 %v1409_v14 }
  0x2d   :  { %1290 = vset.pattern.permute.xlu1 %v1410_v15  ;;  %1295 = vset.pattern.permute.xlu0 %v1411_v16 }
  0x2e   :  { %134 = vperm.xlu1 %1290, %v1460_v2   ;;  %169 = vperm.xlu0 %1295, %v1460_v2  }
  0x2f   :  { %1202 = vmatpush3.bf16.msra.mxu0 %v1201_v34 }
  0x30   :  { %1087 = vmatprep.subr.mxu0 %v1415_v35 }
  0x32   :  { %1291 = vset.pattern.permute.xlu1 %v1412_v22  ;;  %v1204_v22 = vpack.c.bf16 %v49_v20, %v46_v19 }
  0x33   :  { %141 = vperm.xlu1 %1291, %v1460_v2   ;;  %1088 = vmatpush3.msk.msra.mxu0 %vm180_vm0, %v45_v36 }
  0x34   :  { %1203 = vmatprep.subr.bf16.mxu0 %v1409_v14 }
  0x37   :  { %1293 = vset.pattern.permute.xlu1 %v1413_v27  ;;  %v1296_v27 = vpack.i.bf16 %v49_v20, %v46_v19  ;;  %v56_v19 = vld [vmem:[#allocation2 + $0x50] sm:$0xff] }
  0x38   :  { %155 = vperm.xlu1 %1293, %v1460_v2  }
  0x3c   :  { %1294 = vset.pattern.permute.xlu1 %v1414_v31 }
  0x3d   :  { %162 = vperm.xlu1 %1294, %v1460_v2  }
  0x41   :  { %1297 = vrot.lane.b32.xlu1 %v1296_v27, %s1417_s1 }
  0x45   :  { %1302 = vrot.lane.b32.xlu1 %v1301_v28, %s1417_s1 }
  0x94   :  { %v86_v39 = vpop.permute.xlu1 %85  ;;  %v72_v40 = vpop.permute.xlu0 %71 }
  0x95   :  { %vm73_vm2 = vcmp.eq.s32.totalorder %v72_v40, %v69_v38  ;;  %vm87_vm3 = vcmp.eq.s32.totalorder %v86_v39, %v69_v38 }
  0x96   :  { %v982_v41 = vsel %vm73_vm2, 1.0, %v1415_v35  ;;  %v984_v46 = vsel %vm87_vm3, 1.0, %v1415_v35  ;;  %vm176_vm2 = vcmask 818176   ;;  %vm258_vm3 = vcmask 261120  }
  0x99   :  { %v93_v42 = vpop.permute.xlu1 %92  ;;  %v79_v43 = vpop.permute.xlu0 %78 }
  0x9a   :  { %vm80_vm4 = vcmp.eq.s32.totalorder %v79_v43, %v69_v38  ;;  %vm94_vm5 = vcmp.eq.s32.totalorder %v93_v42, %v69_v38  ;;  %v1563_v43 = vld [vmem:[%s1676_s3] sm:$0xff] }
  0x9b   :  { %v983_v44 = vsel %vm80_vm4, 1.0, %v1415_v35  ;;  %v985_v50 = vsel %vm94_vm5, 1.0, %v1415_v35  ;;  %vm552_vm4 = vcmask 523264  }
  0x9c   :  { %v83_v45 = vadd.f32 %v983_v44, %v982_v41  ;;  %v1557_v41 = vshrl.u32 %v68_v37, 7 }
  0x9e   :  { %v90_v47 = vadd.f32 %v984_v46, %v83_v45  ;;  %v100_v48 = vpop.permute.xlu1 %99  ;;  %v107_v49 = vpop.permute.xlu0 %106  ;;  %v256_v42 = vsub.s32 0, %v1557_v41  ;;  %v334_v37 = vsub.s32 1, %v1557_v41 }
  0x9f   :  { %vm101_vm6 = vcmp.eq.s32.totalorder %v100_v48, %v69_v38  ;;  %vm108_vm7 = vcmp.eq.s32.totalorder %v107_v49, %v69_v38 }
  0xa0   :  { %v97_v51 = vadd.f32 %v985_v50, %v90_v47  ;;  %v986_v52 = vsel %vm101_vm6, 1.0, %v1415_v35  ;;  %v987_v54 = vsel %vm108_vm7, 1.0, %v1415_v35  ;;  %v257_v44 = vrot.slane %v1563_v43, %v256_v42 }
  0xa1   :  { %v335_v48 = vrot.slane %v1563_v43, %v334_v37 }
  0xa2   :  { %v104_v53 = vadd.f32 %v986_v52, %v97_v51 }
  0xa3   :  { %v114_v55 = vpop.permute.xlu1 %113  ;;  %v128_v58 = vpop.permute.xlu0 %127 }
  0xa4   :  { %vm115_vm8 = vcmp.eq.s32.totalorder %v114_v55, %v69_v38  ;;  %v111_v56 = vadd.f32 %v987_v54, %v104_v53  ;;  %vm129_vm10 = vcmp.eq.s32.totalorder %v128_v58, %v69_v38 }
  0xa5   :  { %v988_v57 = vsel %vm115_vm8, 1.0, %v1415_v35  ;;  %v990_v63 = vsel %vm129_vm10, 1.0, %v1415_v35 }
  0xa6   :  { %v118_v60 = vadd.f32 %v988_v57, %v111_v56 }
  0xa8   :  { %v121_v59 = vpop.permute.xlu1 %120  ;;  %v149_v3 = vpop.permute.xlu0 %148 }
  0xa9   :  { %vm122_vm9 = vcmp.eq.s32.totalorder %v121_v59, %v69_v38  ;;  %vm150_vm13 = vcmp.eq.s32.totalorder %v149_v3, %v69_v38 }
  0xaa   :  { %v989_v61 = vsel %vm122_vm9, 1.0, %v1415_v35  ;;  %v993_v8 = vsel %vm150_vm13, 1.0, %v1415_v35 }
  0xab   :  { %v125_v62 = vadd.f32 %v989_v61, %v118_v60 }
  0xad   :  { %v135_v0 = vpop.permute.xlu1 %134  ;;  %v132_v1 = vadd.f32 %v990_v63, %v125_v62  ;;  %v170_v10 = vpop.permute.xlu0 %169 }
  0xae   :  { %vm136_vm11 = vcmp.eq.s32.totalorder %v135_v0, %v69_v38  ;;  %vm171_vm15 = vcmp.eq.s32.totalorder %v170_v10, %v69_v38 }
  0xaf   :  { %v991_v2 = vsel %vm136_vm11, 1.0, %v1415_v35  ;;  %v996_v17 = vsel %vm171_vm15, 1.0, %v1415_v35 }
  0xb0   :  { %v139_v5 = vadd.f32 %v991_v2, %v132_v1 }
  0xb2   :  { %v142_v4 = vpop.permute.xlu1 %141 }
  0xb3   :  { %vm143_vm12 = vcmp.eq.s32.totalorder %v142_v4, %v69_v38 }
  0xb4   :  { %v992_v6 = vsel %vm143_vm12, 1.0, %v1415_v35 }
  0xb5   :  { %v146_v7 = vadd.f32 %v992_v6, %v139_v5  ;;  %v442_v6 = vsub.s32 2, %v1557_v41 }
  0xb7   :  { %v156_v9 = vpop.permute.xlu1 %155  ;;  %v153_v11 = vadd.f32 %v993_v8, %v146_v7  ;;  %v447_v7 = vsub.s32 3, %v1557_v41  ;;  %v443_v8 = vrot.slane %v1563_v43, %v442_v6 }
  0xb8   :  { %vm157_vm14 = vcmp.eq.s32.totalorder %v156_v9, %v69_v38 }
  0xb9   :  { %v994_v12 = vsel %vm157_vm14, 1.0, %v1415_v35 }
  0xba   :  { %v160_v15 = vadd.f32 %v994_v12, %v153_v11  ;;  %v448_v11 = vrot.slane %v1563_v43, %v447_v7 }
  0xbc   :  { %v163_v13 = vpop.permute.xlu1 %162 }
  0xbd   :  { %vm164_vm0 = vcmp.eq.s32.totalorder %v163_v13, %v69_v38 }
  0xbe   :  { %v995_v16 = vsel %vm164_vm0, 1.0, %v1415_v35 }
  0xbf   :  { %v167_v18 = vadd.f32 %v995_v16, %v160_v15  ;;  %v47_v15 = vld [vmem:[#allocation2 + $0x8] sm:$0xff]  ;;  %v50_v16 = vld [vmem:[#allocation2 + $0x20] sm:$0xff] }
  0xc0   :  { %v1298_v29 = vpop.permute.xlu1 %1297 }
  0xc1   :  { %v174_v21 = vadd.f32 %v996_v17, %v167_v18  ;;  %v1300_v30 = vunpack.i.h.bf16 %v1298_v29  ;;  %v1299_v31 = vunpack.i.l.bf16 %v1298_v29  ;;  %v1222_v17 = vpack.c.bf16 %v50_v16, %v47_v15  ;;  %v53_v18 = vld [vmem:[#allocation2 + $0x38] sm:$0xff] }
  0xc2   :  { %v1225_v20 = vpack.c.bf16 %v56_v19, %v53_v18 }
  0xc3   :  { %v175_v23 = vmul.f32 0.06666667, %v174_v21  ;;  %v1210_v32 = vpack.c.bf16 %v1300_v30, %v1299_v31  ;;  %v58_v21 = vld [vmem:[#allocation2 + $0x68] sm:$0xff] }
  0xc4   :  { %v1303_v33 = vpop.permute.xlu1 %1302 }
  0xc5   :  { %1090 = vmatmul.mubr.msk.f32.vlgmr.msra.gmra.mrb[0].mxu0 %vm176_vm2, %v175_v23  ;;  %v1305_v34 = vunpack.i.h.bf16 %v1303_v33  ;;  %v1304_v36 = vunpack.i.l.bf16 %v1303_v33  ;;  %1211 = vmatpush3.bf16.msra.mxu1 %v1210_v32 }
  0xc6   :  { %1205 = vmatpush3.bf16.msra.mxu0 %v1204_v22  ;;  %1100 = vmatprep.mubr.msk.f32.mxu0 %vm1416_vm1, %v1415_v35  ;;  %v60_v22 = vld [vmem:[#allocation2 + $0x80] sm:$0xff] }
  0xc7   :  { %1206 = vmatprep.subr.bf16.mxu0 %v1409_v14  ;;  %1212 = vmatprep.subr.bf16.mxu1 %v1409_v14  ;;  %v1213_v38 = vpack.c.bf16 %v1305_v34, %v1304_v36  ;;  %v1228_v23 = vpack.c.bf16 %v60_v22, %v58_v21 }
  0xc9   :  { %1214 = vmatpush3.bf16.msra.mxu1 %v1213_v38 }
  0xca   :  { %1208 = vmatpush3.bf16.msra.mxu0 %v1207_v26  ;;  %1215 = vmatprep.subr.bf16.mxu1 %v1409_v14  ;;  %v1231_v26 = vpack.c.bf16 %v64_v25, %v62_v24 }
  0xcb   :  { %1233 = vmatprep.subr.bf16.mxu0 %v1409_v14 }
 0x198   :  { %v250_v39 = vpop.f32.mrb[0].mxu0 }
 0x199   :  { %v1091_v40 = vpop.f32.mrb[1].mxu0  ;;  %1101 = vmatmul.mubr.msk.f32.vlgmr.msra.gmra.mrb[2].mxu0 %vm258_vm3, %v250_v39 }
 0x19a   :  { %1152 = vmatprep.mubr.msk.f32.mxu0 %vm1416_vm1, %v1415_v35 }
 0x26c   :  { %v328_v45 = vpop.f32.mrb[2].mxu0 }
 0x26d   :  { %v329_v46 = vadd.f32 %v328_v45, %v257_v44  ;;  %v1102_v47 = vpop.f32.mrb[3].mxu0 }
 0x26f   :  { %1112 = vmatmul.mubr.msk.f32.vlgmr.msra.gmra.mrb[0].mxu1 %vm258_vm3, %v329_v46 }
 0x270   :  { %1122 = vmatprep.mubr.msk.f32.mxu1 %vm1416_vm1, %v1415_v35 }
 0x342   :  { %v421_v49 = vpop.f32.mrb[0].mxu1 }
 0x343   :  { %v422_v50 = vadd.f32 %v421_v49, %v335_v48  ;;  %v1113_v51 = vpop.f32.mrb[1].mxu1 }
 0x345   :  { %v425_v52 = vadd.f32 %v422_v50, %v329_v46  ;;  %v550_v46 = vsub.s32 5, %v1557_v41 }
 0x347   :  { %v426_v53 = vsel %vm258_vm3, %v425_v52, 0.0  ;;  %v551_v47 = vrot.slane %v1563_v43, %v550_v46 }
 0x348   :  { %427 = vadd.xlane.f32.xlu0 %v426_v53  ;;  %v1316_v53 = vpack.i.bf16 %v50_v16, %v47_v15 }
 0x35e   :  { %1307 = vrot.lane.b32.xlu0 %v1296_v27, %s1418_s0  ;;  %v452_v27 = vsub.s32 4, %v1557_v41 }
 0x3d5   :  { %v428_v54 = vpop.xlane.xlu0 %427 }
 0x3d6   :  { %v430_v55 = vmul.f32 0.03125, %v428_v54 }
 0x3d8   :  { %v431_v56 = vsub.f32 %v425_v52, %v430_v55 }
 0x3d9   :  { %v1308_v59 = vpop.permute.xlu0 %1307 }
 0x3da   :  { %v432_v57 = vmul.f32 %v431_v56, %v431_v56  ;;  %v1310_v60 = vunpack.i.h.bf16 %v1308_v59  ;;  %v1309_v61 = vunpack.i.l.bf16 %v1308_v59  ;;  %v1321_v59 = vpack.i.bf16 %v56_v19, %v53_v18  ;;  %v1625_v18 = vld [vmem:[%s1676_s3 + $0x8] sm:$0x7f]  ;;  %s1419_s3 = smov [#allocation5]  }
 0x3db   :  { %v653_v19 = vrot.slane %v1625_v18, %v256_v42  ;;  %s973_s6 = sshll.u32 %s1419_s3, 4  ;;  %s974_s6 = int_to_ptr.vmem [resolvable:$true] %s973_s6 }
 0x3dc   :  { %v433_v58 = vsel %vm258_vm3, %v432_v57, 0.0  ;;  %v1216_v62 = vpack.c.bf16 %v1310_v60, %v1309_v61  ;;  %s1370_s7 = scalar_lea.vmem %s974_s6, 128  ;;  %p1375_p9 = scmp.lt.s32.totalorder %s974_s6, %s974_s6 }
 0x3dd   :  { %434 = vadd.xlane.f32.xlu1 %v433_v58  ;;  %p1371_p8 = scmp.ne.s32.totalorder %s974_s6, %s1370_s7  ;;  %p1376_p10 = scmp.lt.s32.totalorder %s1370_s7, %s1370_s7 }
 0x3de   :  { %1217 = vmatpush3.bf16.msra.mxu1 %v1216_v62 }
 0x3df   :  { %1218 = vmatprep.subr.bf16.mxu1 %v1409_v14  ;;  %p1377_p11 = por %p1376_p10, %p1375_p9 }
 0x3e1   :  { %p1378_p12 = pnand %p1377_p11, %p1371_p8 }
 0x3ee   :  { %1312 = vrot.lane.b32.xlu1 %v1301_v28, %s1418_s0  ;;  %v453_v28 = vrot.slane %v1563_v43, %v452_v27 }
 0x46a   :  { %v435_v63 = vpop.xlane.xlu1 %434 }
 0x46b   :  { %v436_v0 = vmul.f32 0.03125, %v435_v63 }
 0x46d   :  { %v437_v1 = vadd.f32 1e-05, %v436_v0 }
 0x46e   :  { %v1313_v2 = vpop.permute.xlu1 %1312 }
 0x46f   :  { %1336 = vrsqrt.f32 %v437_v1  ;;  %v1315_v3 = vunpack.i.h.bf16 %v1313_v2  ;;  %v1314_v4 = vunpack.i.l.bf16 %v1313_v2 }
 0x471   :  { %v1219_v5 = vpack.c.bf16 %v1315_v3, %v1314_v4 }
 0x473   :  { %1220 = vmatpush3.bf16.msra.mxu1 %v1219_v5 }
 0x474   :  { %1221 = vmatprep.subr.bf16.mxu1 %v1409_v14 }
 0x479   :  { %v1337_v9 = vpop.eup %1336 }
 0x47a   :  { %v439_v10 = vmul.f32 %v1337_v9, %v431_v56  ;;  %v642_v9 = vsub.s32 6, %v1557_v41 }
 0x47c   :  { %v444_v12 = vmul.f32 %v443_v8, %v439_v10  ;;  %v647_v10 = vsub.s32 7, %v1557_v41 }
 0x47e   :  { %v449_v13 = vadd.f32 %v448_v11, %v444_v12  ;;  %v643_v11 = vrot.slane %v1563_v43, %v642_v9  ;;  %v648_v15 = vrot.slane %v1563_v43, %v647_v10 }
 0x480   :  { %1123 = vmatmul.mubr.msk.f32.vlgmr.msra.gmra.mrb[2].mxu1 %vm258_vm3, %v449_v13 }
 0x481   :  { %1141 = vmatprep.mubr.msk.f32.mxu1 %vm1416_vm1, %v1415_v35  ;;  %1223 = vmatpush3.bf16.msra.mxu1 %v1222_v17 }
 0x482   :  { %1224 = vmatprep.subr.bf16.mxu1 %v1409_v14 }
 0x485   :  { %1226 = vmatpush3.bf16.msra.mxu1 %v1225_v20 }
 0x486   :  { %1227 = vmatprep.subr.bf16.mxu1 %v1409_v14 }
 0x489   :  { %1229 = vmatpush3.bf16.msra.mxu1 %v1228_v23 }
 0x48a   :  { %1230 = vmatprep.subr.bf16.mxu1 %v1409_v14 }
 0x48d   :  { %1232 = vmatpush3.bf16.msra.mxu1 %v1231_v26 }
 0x48e   :  { %1245 = vmatprep.subr.bf16.mxu1 %v1409_v14 }
 0x553   :  { %v535_v29 = vpop.f32.mrb[2].mxu1 }
 0x554   :  { %v536_v30 = vadd.f32 %v535_v29, %v453_v28  ;;  %v1124_v31 = vpop.f32.mrb[3].mxu1 }
 0x556   :  { %v540_v32 = vmul.f32 0.044715, %v536_v30  ;;  %v539_v40 = vmul.f32 0.5, %v536_v30 }
 0x558   :  { %v541_v33 = vmul.f32 %v540_v32, %v536_v30 }
 0x55a   :  { %v542_v34 = vmul.f32 %v541_v33, %v536_v30 }
 0x55c   :  { %v543_v36 = vadd.f32 %v542_v34, %v536_v30 }
 0x55e   :  { %v544_v38 = vmul.f32 0.7978846, %v543_v36 }
 0x560   :  { %1338 = vtanh.f32 %v544_v38 }
 0x56a   :  { %v1339_v39 = vpop.eup %1338 }
 0x56b   :  { %v546_v44 = vadd.f32 1.0, %v1339_v39 }
 0x56d   :  { %v547_v45 = vmul.f32 %v546_v44, %v539_v40  ;;  %v760_v44 = vrot.slane %v1625_v18, %v334_v37  ;;  %v59_v37 = vld [vmem:[#allocation2 + $0x70] sm:$0xff] }
 0x56f   :  { %1142 = vmatmul.mubr.msk.f32.vlgmr.msra.gmra.mrb[4].mxu1 %vm552_vm4, %v547_v45 }
 0x570   :  { %1182 = vmatprep.mubr.msk.f32.mxu1 %vm1416_vm1, %v1415_v35 }
 0x642   :  { %v622_v48 = vpop.f32.mrb[4].mxu1 }
 0x643   :  { %v623_v49 = vadd.f32 %v622_v48, %v551_v47  ;;  %v1143_v50 = vpop.f32.mrb[5].mxu1  ;;  %v765_v48 = vrot.slane %v1625_v18, %v442_v6  ;;  %v63_v6 = vld [vmem:[#allocation2 + $0xa0] sm:$0xff] }
 0x645   :  { %v626_v51 = vadd.f32 %v623_v49, %v449_v13 }
 0x647   :  { %v627_v52 = vsel %vm258_vm3, %v626_v51, 0.0 }
 0x648   :  { %628 = vadd.xlane.f32.xlu0 %v627_v52  ;;  %v51_v52 = vld [vmem:[#allocation2 + $0x28] sm:$0xff] }
 0x65e   :  { %1317 = vrot.lane.b32.xlu0 %v1316_v53, %s1417_s1 }
 0x6d5   :  { %v629_v54 = vpop.xlane.xlu0 %628 }
 0x6d6   :  { %v630_v55 = vmul.f32 0.03125, %v629_v54  ;;  %v54_v54 = vld [vmem:[#allocation2 + $0x40] sm:$0xff] }
 0x6d8   :  { %v631_v56 = vsub.f32 %v626_v51, %v630_v55  ;;  %v48_v51 = vld [vmem:[#allocation2 + $0x10] sm:$0xff]  ;;  %v57_v55 = vld [vmem:[#allocation2 + $0x58] sm:$0xff] }
 0x6d9   :  { %v1318_v60 = vpop.permute.xlu0 %1317 }
 0x6da   :  { %v632_v57 = vmul.f32 %v631_v56, %v631_v56  ;;  %v1320_v61 = vunpack.i.h.bf16 %v1318_v60  ;;  %v1319_v62 = vunpack.i.l.bf16 %v1318_v60 }
 0x6dc   :  { %v633_v58 = vsel %vm258_vm3, %v632_v57, 0.0  ;;  %v1234_v63 = vpack.c.bf16 %v1320_v61, %v1319_v62  ;;  %v61_v57 = vld [vmem:[#allocation2 + $0x88] sm:$0xff]  ;;  %v770_v61 = vrot.slane %v1625_v18, %v447_v7 }
 0x6dd   :  { %634 = vadd.xlane.f32.xlu1 %v633_v58  ;;  %v1252_v58 = vpack.c.bf16 %v61_v57, %v59_v37 }
 0x6de   :  { %1235 = vmatpush3.bf16.msra.mxu0 %v1234_v63 }
 0x6df   :  { %1236 = vmatprep.subr.bf16.mxu0 %v1409_v14 }
 0x6ee   :  { %1322 = vrot.lane.b32.xlu1 %v1321_v59, %s1417_s1 }
 0x76a   :  { %v635_v0 = vpop.xlane.xlu1 %634 }
 0x76b   :  { %v636_v1 = vmul.f32 0.03125, %v635_v0 }
 0x76d   :  { %v637_v2 = vadd.f32 1e-05, %v636_v1 }
 0x76e   :  { %v1323_v3 = vpop.permute.xlu1 %1322 }
 0x76f   :  { %1340 = vrsqrt.f32 %v637_v2  ;;  %v1325_v4 = vunpack.i.h.bf16 %v1323_v3  ;;  %v1324_v5 = vunpack.i.l.bf16 %v1323_v3 }
 0x771   :  { %v1237_v8 = vpack.c.bf16 %v1325_v4, %v1324_v5 }
 0x773   :  { %1238 = vmatpush3.bf16.msra.mxu0 %v1237_v8 }
 0x774   :  { %1239 = vmatprep.subr.bf16.mxu0 %v1409_v14 }
 0x779   :  { %v1341_v12 = vpop.eup %1340 }
 0x77a   :  { %v639_v13 = vmul.f32 %v1341_v12, %v631_v56  ;;  %v1249_v56 = vpack.c.bf16 %v57_v55, %v54_v54 }
 0x77c   :  { %v644_v16 = vmul.f32 %v643_v11, %v639_v13 }
 0x77e   :  { %v649_v17 = vadd.f32 %v648_v15, %v644_v16 }
 0x780   :  { %1153 = vmatmul.mubr.msk.f32.vlgmr.msra.gmra.mrb[4].mxu0 %vm258_vm3, %v649_v17 }
 0x781   :  { %1163 = vmatprep.mubr.msk.f32.mxu0 %vm1416_vm1, %v1415_v35 }
 0x853   :  { %v739_v20 = vpop.f32.mrb[4].mxu0 }
 0x854   :  { %v740_v21 = vadd.f32 %v739_v20, %v653_v19  ;;  %v1154_v22 = vpop.f32.mrb[5].mxu0 }
 0x856   :  { %v743_v43 = vadd.f32 %v740_v21, %v649_v17 }
 0x858   :  { %v744_v23 = vsel %vm258_vm3, %v743_v43, 0.0 }
 0x859   :  { %745 = vadd.xlane.f32.xlu0 %v744_v23 }
 0x86f   :  { %1327 = vrot.lane.b32.xlu0 %v1316_v53, %s1418_s0  ;;  %v1246_v53 = vpack.c.bf16 %v51_v52, %v48_v51 }
 0x871   :  { %1247 = vmatpush3.bf16.msra.mxu1 %v1246_v53 }
 0x872   :  { %1248 = vmatprep.subr.bf16.mxu1 %v1409_v14 }
 0x875   :  { %1250 = vmatpush3.bf16.msra.mxu1 %v1249_v56 }
 0x876   :  { %1251 = vmatprep.subr.bf16.mxu1 %v1409_v14 }
 0x879   :  { %1253 = vmatpush3.bf16.msra.mxu1 %v1252_v58 }
 0x87a   :  { %1254 = vmatprep.subr.bf16.mxu1 %v1409_v14 }
 0x8e6   :  { %v746_v24 = vpop.xlane.xlu0 %745 }
 0x8e7   :  { %v747_v35 = vmul.f32 0.03125, %v746_v24 }
 0x8e9   :  { %v748_v25 = vsub.f32 %v743_v43, %v747_v35 }
 0x8ea   :  { %v1328_v29 = vpop.permute.xlu0 %1327 }
 0x8eb   :  { %v749_v26 = vmul.f32 %v748_v25, %v748_v25  ;;  %v1330_v42 = vunpack.i.h.bf16 %v1328_v29  ;;  %v1329_v30 = vunpack.i.l.bf16 %v1328_v29 }
 0x8ed   :  { %v750_v28 = vsel %vm258_vm3, %v749_v26, 0.0  ;;  %v1240_v31 = vpack.c.bf16 %v1330_v42, %v1329_v30 }
 0x8ee   :  { %751 = vadd.xlane.f32.xlu1 %v750_v28  ;;  %v964_v28 = vrot.slane %v1625_v18, %v642_v9 }
 0x8ef   :  { %1241 = vmatpush3.bf16.msra.mxu0 %v1240_v31 }
 0x8f0   :  { %1242 = vmatprep.subr.bf16.mxu0 %v1409_v14  ;;  %v868_v14 = vrot.slane %v1625_v18, %v452_v27  ;;  %v959_v27 = vrot.slane %v1625_v18, %v550_v46 }
 0x8ff   :  { %1332 = vrot.lane.b32.xlu1 %v1321_v59, %s1418_s0  ;;  %v65_v59 = vld [vmem:[#allocation2 + $0xb8] sm:$0xff] }
 0x900   :  { %v1255_v60 = vpack.c.bf16 %v65_v59, %v63_v6 }
 0x902   :  { %1256 = vmatpush3.bf16.msra.mxu1 %v1255_v60 }
 0x97b   :  { %v752_v32 = vpop.xlane.xlu1 %751 }
 0x97c   :  { %v753_v33 = vmul.f32 0.03125, %v752_v32 }
 0x97e   :  { %v754_v34 = vadd.f32 1e-05, %v753_v33 }
 0x97f   :  { %v1333_v36 = vpop.permute.xlu1 %1332 }
 0x980   :  { %1342 = vrsqrt.f32 %v754_v34  ;;  %v1335_v38 = vunpack.i.h.bf16 %v1333_v36  ;;  %v1334_v39 = vunpack.i.l.bf16 %v1333_v36 }
 0x982   :  { %v1243_v40 = vpack.c.bf16 %v1335_v38, %v1334_v39 }
 0x984   :  { %1244 = vmatpush3.bf16.msra.mxu0 %v1243_v40 }
 0x98a   :  { %v1343_v45 = vpop.eup %1342 }
 0x98b   :  { %v756_v47 = vmul.f32 %v1343_v45, %v748_v25 }
 0x98d   :  { %v761_v49 = vmul.f32 %v760_v44, %v756_v47 }
 0x98f   :  { %v766_v50 = vadd.f32 %v765_v48, %v761_v49 }
 0x991   :  { %1164 = vmatmul.mubr.msk.f32.vlgmr.msra.gmra.mrb[6].mxu0 %vm258_vm3, %v766_v50 }
 0xa64   :  { %v852_v62 = vpop.f32.mrb[6].mxu0 }
 0xa65   :  { %v853_v63 = vadd.f32 %v852_v62, %v770_v61  ;;  %v1165_v0 = vpop.f32.mrb[7].mxu0 }
 0xa67   :  { %v857_v1 = vmul.f32 0.044715, %v853_v63  ;;  %v856_v10 = vmul.f32 0.5, %v853_v63 }
 0xa69   :  { %v858_v2 = vmul.f32 %v857_v1, %v853_v63 }
 0xa6b   :  { %v859_v3 = vmul.f32 %v858_v2, %v853_v63 }
 0xa6d   :  { %v860_v4 = vadd.f32 %v859_v3, %v853_v63 }
 0xa6f   :  { %v861_v5 = vmul.f32 0.7978846, %v860_v4 }
 0xa71   :  { %1344 = vtanh.f32 %v861_v5 }
 0xa7b   :  { %v1345_v8 = vpop.eup %1344 }
 0xa7c   :  { %v863_v11 = vadd.f32 1.0, %v1345_v8 }
 0xa7e   :  { %v864_v12 = vmul.f32 %v863_v11, %v856_v10 }
 0xa80   :  { %1183 = vmatmul.mubr.msk.f32.vlgmr.msra.gmra.mrb[6].mxu1 %vm552_vm4, %v864_v12 }
 0xb53   :  { %v938_v7 = vpop.f32.mrb[6].mxu1 }
 0xb54   :  { %v939_v13 = vadd.f32 %v938_v7, %v868_v14  ;;  %v1184_v15 = vpop.f32.mrb[7].mxu1 }
 0xb56   :  { %v942_v16 = vadd.f32 %v939_v13, %v766_v50 }
 0xb58   :  { %v943_v17 = vsel %vm258_vm3, %v942_v16, 0.0 }
 0xb59   :  { %944 = vadd.xlane.f32.xlu0 %v943_v17 }
 0xbe6   :  { %v945_v19 = vpop.xlane.xlu0 %944 }
 0xbe7   :  { %v946_v20 = vmul.f32 0.03125, %v945_v19 }
 0xbe9   :  { %v947_v21 = vsub.f32 %v942_v16, %v946_v20 }
 0xbeb   :  { %v948_v22 = vmul.f32 %v947_v21, %v947_v21 }
 0xbed   :  { %v949_v43 = vsel %vm258_vm3, %v948_v22, 0.0 }
 0xbee   :  { %950 = vadd.xlane.f32.xlu1 %v949_v43 }
 0xc7b   :  { %v951_v23 = vpop.xlane.xlu1 %950 }
 0xc7c   :  { %v952_v24 = vmul.f32 0.03125, %v951_v23 }
 0xc7e   :  { %v953_v35 = vadd.f32 1e-05, %v952_v24 }
 0xc80   :  { %1346 = vrsqrt.f32 %v953_v35 }
 0xc8a   :  { %v1347_v25 = vpop.eup %1346 }
 0xc8b   :  { %v955_v26 = vmul.f32 %v1347_v25, %v947_v21 }
 0xc8d   :  { %v960_v29 = vmul.f32 %v959_v27, %v955_v26 }
 0xc8f   :  { %v965_v42 = vadd.f32 %v964_v28, %v960_v29 }
 0xc91   :  { %966 = vst.msk [vmem:[#allocation5] sm:$0xff] %vm258_vm3, %v965_v42 }
 0xc92   :  { %1381 = shalt.err (!%p1378_p12)
}
 0xc93   :  { %s1382_s10 = scalar_lea.hbm %s1677_s4, 128 }
 0xc94   :  { %p1383_p13 = scmp.ne.s32.totalorder %s1677_s4, %s1382_s10  ;;  %p1386_p0 = scmp.lt.u32.totalorder %s1382_s10, %s1677_s4 }
 0xc96   :  { %p1388_p1 = pnand %p1386_p0, %p1383_p13 }
 0xc98   :  { %1391 = shalt.err (!%p1388_p1)
}
 0xc99   :  { %976 = dma.vmem_to_hbm [thread:$0]  %s974_s6, 128, %s1677_s4, [#allocation4]  }
 0xc9a   :  { %1394 = dma.done.wait [#allocation4], 128  }
 0xc9b   :  { %1395 = vsyncadd [#allocation4], 4294967168 }
 0xc9c   :  { %980 = vsyncpa [#allocation3], 1 }
 0xc9d   :  { %981 = vsyncpa [#allocation4], 1 }

</bundles_post_ra>
